<compile_context>
chip_gen: v5e
topology: v5e:2x2
jax: 0.10.0
libtpu: 0.0.40
codegen_flags: <defaults>
</compile_context>

<pallas_src>
import functools

import jax
import jax.numpy as jnp
from jax import lax
from jax.experimental import pallas as pl
from jax.experimental.pallas import tpu as pltpu


def _round_up(v, m):
    return ((v + m - 1) // m) * m


def _nn_kernel(x_ref, w_ref, out_ref, *, K, K2, K3, r1, r2, apply_softmax):
    """Fused MLP forward with the batch axis on lanes.

    x_ref   : (TN, K)   input rows (batch-first, f32)
    w_ref   : (R,  W)   packed weights:
                          rows [0:K2)        -> [W1 | b1]   (K2, K+1)
                          rows [r1:r1+K3)    -> [W2 | b2]   (K3, K2+1)
                          rows [r1+r2:+K3)   -> w3 column   (K3, 1)
                        r1, r2 are multiples of 8 (sublane-tile aligned).
    out_ref : (1, TN)   lane-dense output row (softmaxed over TN if eval).
    """
    x = x_ref[...]                                   # (TN, K)

    # Static, tile-aligned slices of the packed weight buffer.
    w1 = w_ref[0:K2, 0:K]                            # (K2, K)
    b1 = w_ref[0:K2, K:K + 1]                        # (K2, 1)
    w2 = w_ref[r1:r1 + K3, 0:K2]                     # (K3, K2)
    b2 = w_ref[r1:r1 + K3, K2:K2 + 1]                # (K3, 1)
    w3 = w_ref[r1 + r2:r1 + r2 + K3, 0:1]            # (K3, 1)

    # Layer 1: h1[k2, n] = tanh( sum_k W1[k2, k] * x[n, k] + b1[k2] )
    # Contract the last dim of both operands so the batch lands on lanes.
    h1 = jnp.tanh(
        lax.dot_general(w1, x, (((1,), (1,)), ((), ())),
                        preferred_element_type=jnp.float32)
        + b1)                                        # (K2, TN)

    # Layer 2: (K3, K2) @ (K2, TN) + bias column.
    h2 = jnp.tanh(
        jnp.dot(w2, h1, preferred_element_type=jnp.float32)
        + b2)                                        # (K3, TN)

    # Layer 3 (K3 -> 1, no bias): VPU multiply + sublane reduce — no 1-wide
    # MXU matmul with a mostly-dead result FIFO.
    logits = jnp.sum(h2 * w3, axis=0, keepdims=True)  # (1, TN)

    if apply_softmax:
        # torch.nn.Softmax(dim=0) over the batch axis == lane axis here.
        m = jnp.max(logits, axis=-1, keepdims=True)
        e = jnp.exp(logits - m)
        s = jnp.sum(e, axis=-1, keepdims=True)
        out_ref[...] = e / s          # exact normalization (rows sum to 1)
    else:
        out_ref[...] = logits


def pack_params(params):
    """One-time packing of torch-convention weights into a single buffer.

    Call ONCE and reuse; keeps all transposes/concats/pads out of the per-call
    path and collapses 5 weight/bias operands into one DMA.
    params: w1 (K2, K), b1 (K2,), w2 (K3, K2), b2 (K3,), w3 (1, K3)
    """
    w1, b1 = params["w1"], params["b1"]
    w2, b2 = params["w2"], params["b2"]
    w3 = params["w3"]
    K2, K = w1.shape
    K3 = w2.shape[0]

    r1 = _round_up(K2, 8)          # sublane-aligned start of the W2 section
    r2 = _round_up(K3, 8)          # sublane-aligned start of the w3 section
    R = r1 + r2 + K3
    W = max(K + 1, K2 + 1)

    buf = jnp.zeros((R, W), jnp.float32)
    buf = buf.at[0:K2, 0:K].set(w1.astype(jnp.float32))
    buf = buf.at[0:K2, K].set(b1.astype(jnp.float32))
    buf = buf.at[r1:r1 + K3, 0:K2].set(w2.astype(jnp.float32))
    buf = buf.at[r1:r1 + K3, K2].set(b2.astype(jnp.float32))
    buf = buf.at[r1 + r2:r1 + r2 + K3, 0].set(w3[0].astype(jnp.float32))
    return {"wpack": buf, "dims": (int(K), int(K2), int(K3), int(r1), int(r2))}


def _pick_batch_tile(n):
    """Lane-dense batch tile: 256 fills v6e/v7x MXU columns, 128 fills v5e."""
    if n % 256 == 0:
        return 256
    if n % 128 == 0:
        return 128
    return None


def nn_forward(x, packed, *, train=False):
    """Forward pass of NN with one Pallas kernel call.

    x      : (N, K) or (K,) float32
    packed : output of pack_params()
    """
    wpack = packed["wpack"]
    K, K2, K3, r1, r2 = packed["dims"]

    x_was_1d = (x.ndim == 1)
    x2 = (x[None, :] if x_was_1d else x).astype(jnp.float32)   # (N, K)
    N = x2.shape[0]
    # torch: softmax only when (not train) and x.dim() > 1
    apply_softmax = (not train) and (not x_was_1d)

    kernel = functools.partial(
        _nn_kernel, K=K, K2=K2, K3=K3, r1=r1, r2=r2,
        apply_softmax=apply_softmax)

    tn = None if apply_softmax else _pick_batch_tile(N)
    if tn is not None and N > tn:
        # Train/no-softmax path, large batch: grid over N, batch axis parallel
        # (shards across v7x's 2 TensorCores; neutral on v5e/v6e).
        # Per-block VMEM: 2 bufs * (tn*K + |wpack|) * 4 B ≈ tens of KiB — far
        # below even v7x's 32 MiB default scoped limit.
        out_row = pl.pallas_call(
            kernel,
            out_shape=jax.ShapeDtypeStruct((1, N), jnp.float32),
            grid=(N // tn,),
            in_specs=[pl.BlockSpec((tn, K), lambda i: (i, 0)),
                      pl.BlockSpec(wpack.shape, lambda i: (0, 0))],
            out_specs=pl.BlockSpec((1, tn), lambda i: (0, i)),
            compiler_params=pltpu.CompilerParams(
                dimension_semantics=("parallel",)),
        )(x2, wpack)
    else:
        # Single-block fused path (eval softmax needs the whole batch resident).
        vmem = pl.BlockSpec(memory_space=pltpu.MemorySpace.VMEM)
        out_row = pl.pallas_call(
            kernel,
            out_shape=jax.ShapeDtypeStruct((1, N), jnp.float32),
            in_specs=[vmem, vmem],
            out_specs=vmem,
        )(x2, wpack)

    if apply_softmax:
        # (1, N) row is contiguous, so this is a free reshape, not a transpose.
        return out_row.reshape(N, 1)      # matches torch softmax(dim=0) on (N, 1)
    if train:
        if x_was_1d:
            return out_row.reshape(())    # torch.squeeze((1,)) -> scalar
        return jnp.squeeze(out_row.reshape(N, 1))   # torch.squeeze((N, 1)) -> (N,)
    # eval with 1-D input: torch returns the raw (1,) logit (no softmax)
    return out_row.reshape(N)


def init_params(key, K, K2, K3):
    """Deterministic parameter init (torch.nn.Linear-style uniform bounds)."""
    k1, k2, k3, k4, k5 = jax.random.split(key, 5)

    def u(k, shape, fan_in):
        bound = 1.0 / jnp.sqrt(fan_in)
        return jax.random.uniform(k, shape, jnp.float32, -bound, bound)

    return {
        "w1": u(k1, (K2, K), K),
        "b1": u(k2, (K2,), K),
        "w2": u(k3, (K3, K2), K2),
        "b2": u(k4, (K3,), K2),
        "w3": u(k5, (1, K3), K3),
    }


def _reference(x, params):
    h1 = jnp.tanh(x @ params["w1"].T + params["b1"])
    h2 = jnp.tanh(h1 @ params["w2"].T + params["b2"])
    return h2 @ params["w3"].T            # (N, 1) logits


if __name__ == "__main__":
    K, K2, K3 = 32, 16, 8
    N = 128          # full lane-width batch: unmasked output store + reduces
    N_big = 512      # exercises the gridded (parallel-over-N) train path

    key = jax.random.PRNGKey(0)
    kx, kxb, kp = jax.random.split(key, 3)
    x = jax.random.normal(kx, (N, K), jnp.float32)
    x_big = jax.random.normal(kxb, (N_big, K), jnp.float32)
    params = init_params(kp, K, K2, K3)
    packed = pack_params(params)          # done ONCE, outside the hot path

    # Eval path (train=False): softmax over dim 0, as in the PyTorch module.
    out_eval = jax.block_until_ready(nn_forward(x, packed, train=False))
    # Train path (train=True): raw scores, squeezed (single-block, N=128).
    out_train = jax.block_until_ready(nn_forward(x, packed, train=True))
    # Train path, large batch: gridded over N (TN=256, "parallel").
    out_train_big = jax.block_until_ready(nn_forward(x_big, packed, train=True))

    # Pure-JAX reference (not part of the kernel hot path).
    logits = _reference(x, params)
    logits_big = _reference(x_big, params)
    ref_eval = jax.nn.softmax(logits, axis=0)
    ref_train = jnp.squeeze(logits)
    ref_train_big = jnp.squeeze(logits_big)

    assert out_eval.shape == (N, 1) and out_train.shape == (N,)
    assert out_train_big.shape == (N_big,)
    assert jnp.allclose(out_train, ref_train, atol=1e-5), "train mismatch"
    assert jnp.allclose(out_train_big, ref_train_big, atol=1e-5), "gridded train mismatch"
    assert jnp.allclose(out_eval, ref_eval, rtol=1e-4, atol=1e-6), "eval mismatch"

    # 1-D input path: matches torch (no softmax when x.dim() == 1).
    o1 = jax.block_until_ready(nn_forward(x[0], packed, train=False))
    assert o1.shape == (1,) and jnp.allclose(o1, logits[0], atol=1e-5), "1-D mismatch"

    print("KERNEL_OK")
</pallas_src>

<mosaic_0001>
module attributes {stable_mosaic.version = 11 : i64} {
  func.func @_nn_kernel(%arg0: memref<128x32xf32, #tpu.memory_space<vmem>>, %arg1: memref<32x33xf32, #tpu.memory_space<vmem>>, %arg2: memref<1x128xf32, #tpu.memory_space<vmem>>) attributes {dimension_semantics = [], scalar_prefetch = 0 : i64, scratch_operands = 0 : i64, tpu.core_type = #tpu.core_type<tc>} {
    %c0 = arith.constant 0 : index
    %c0_0 = arith.constant 0 : index
    %0 = vector.load %arg0[%c0, %c0_0] : memref<128x32xf32, #tpu.memory_space<vmem>>, vector<128x32xf32>
    %c0_1 = arith.constant 0 : index
    %c0_2 = arith.constant 0 : index
    %1 = vector.load %arg1[%c0_1, %c0_2] : memref<32x33xf32, #tpu.memory_space<vmem>>, vector<16x32xf32>
    %c0_3 = arith.constant 0 : index
    %c32 = arith.constant 32 : index
    %2 = vector.load %arg1[%c0_3, %c32] : memref<32x33xf32, #tpu.memory_space<vmem>>, vector<16x1xf32>
    %c16 = arith.constant 16 : index
    %c0_4 = arith.constant 0 : index
    %3 = vector.load %arg1[%c16, %c0_4] : memref<32x33xf32, #tpu.memory_space<vmem>>, vector<8x16xf32>
    %c16_5 = arith.constant 16 : index
    %c16_6 = arith.constant 16 : index
    %4 = vector.load %arg1[%c16_5, %c16_6] : memref<32x33xf32, #tpu.memory_space<vmem>>, vector<8x1xf32>
    %c24 = arith.constant 24 : index
    %c0_7 = arith.constant 0 : index
    %5 = vector.load %arg1[%c24, %c0_7] : memref<32x33xf32, #tpu.memory_space<vmem>>, vector<8x1xf32>
    %cst = arith.constant dense<0.000000e+00> : vector<16x128xf32>
    %6 = tpu.matmul %1, %0, %cst {dimension_numbers = #tpu.dot_dimension_numbers<[1], [1], [0], [0], [0, 0, 1, 0], [], []>} : vector<16x32xf32>, vector<128x32xf32>, vector<16x128xf32> -> vector<16x128xf32>
    %7 = vector.broadcast %2 : vector<16x1xf32> to vector<16x128xf32>
    %8 = arith.addf %6, %7 : vector<16x128xf32>
    %9 = math.tanh %8 : vector<16x128xf32>
    %cst_8 = arith.constant dense<0.000000e+00> : vector<8x128xf32>
    %10 = tpu.matmul %3, %9, %cst_8 {dimension_numbers = #tpu.dot_dimension_numbers<[1], [0], [0], [1], [0, 0, 1, 1], [], []>} : vector<8x16xf32>, vector<16x128xf32>, vector<8x128xf32> -> vector<8x128xf32>
    %11 = vector.broadcast %4 : vector<8x1xf32> to vector<8x128xf32>
    %12 = arith.addf %10, %11 : vector<8x128xf32>
    %13 = math.tanh %12 : vector<8x128xf32>
    %14 = vector.broadcast %5 : vector<8x1xf32> to vector<8x128xf32>
    %15 = arith.mulf %13, %14 : vector<8x128xf32>
    %cst_9 = arith.constant dense<0.000000e+00> : vector<128xf32>
    %16 = vector.multi_reduction <add>, %15, %cst_9 [0] : vector<8x128xf32> to vector<128xf32>
    %17 = vector.shape_cast %16 : vector<128xf32> to vector<1x128xf32>
    %cst_10 = arith.constant dense<0xFF800000> : vector<1xf32>
    %18 = vector.multi_reduction <maximumf>, %17, %cst_10 [1] : vector<1x128xf32> to vector<1xf32>
    %19 = vector.shape_cast %18 : vector<1xf32> to vector<1x1xf32>
    %20 = vector.broadcast %19 : vector<1x1xf32> to vector<1x128xf32>
    %21 = arith.subf %17, %20 : vector<1x128xf32>
    %22 = math.exp %21 : vector<1x128xf32>
    %cst_11 = arith.constant dense<0.000000e+00> : vector<1xf32>
    %23 = vector.multi_reduction <add>, %22, %cst_11 [1] : vector<1x128xf32> to vector<1xf32>
    %24 = vector.shape_cast %23 : vector<1xf32> to vector<1x1xf32>
    %25 = vector.broadcast %24 : vector<1x1xf32> to vector<1x128xf32>
    %26 = arith.divf %22, %25 : vector<1x128xf32>
    %c0_12 = arith.constant 0 : index
    %c0_13 = arith.constant 0 : index
    %27 = vector.load %arg2[%c0_12, %c0_13] : memref<1x128xf32, #tpu.memory_space<vmem>>, vector<1x128xf32>
    tpu.vector_store %arg2[%c0_12, %c0_13], %26 {strides = array<i32>} : memref<1x128xf32, #tpu.memory_space<vmem>>, vector<1x128xf32>,
    return
  }
}

</mosaic_0001>

<bundles_post_ra>
// kernel: tpu_custom_call.1
= control target key start
LH: loop header
LB: loop body
LE: loop exit
PB: predicated region body
PF: predicated region fallthrough
CT: control target
= control target key end

     0   :  { %vm42_vm0 = vcmask 261120   ;;  %s395_s0 = inlined_call_operand.vmem [shape: f32[128,32], index: 0, kind: input, shape index: {}]   ;;  %s396_s1 = inlined_call_operand.vmem [shape: f32[32,33], index: 1, kind: input, shape index: {}]   ;;  %s397_s2 = inlined_call_operand.hbm [shape: f32[1,128], index: 2, kind: output, shape index: {}]  }
   0x1   :  { %v27_v0 = vld [vmem:[%s395_s0 + $0x78] sm:$0xff]  ;;  %v26_v1 = vld [vmem:[%s395_s0 + $0x70] sm:$0xff] }
   0x2   :  { %200 = vmatpush.xpose.msk.msra.mxu0 %vm42_vm0, %v27_v0  ;;  %219 = vmatpush.xpose.msk.msra.mxu2 %vm42_vm0, %v27_v0 }
   0x3   :  { %7 = vsyncpa [#allocation3], 0  ;;  %v25_v2 = vld [vmem:[%s395_s0 + $0x68] sm:$0xff]  ;;  %v24_v3 = vld [vmem:[%s395_s0 + $0x60] sm:$0xff]  ;;  %v279_v11 = vmov 32   ;;  %v280_v20 = vmov 16  }
   0x4   :  { %v23_v4 = vld [vmem:[%s395_s0 + $0x58] sm:$0xff]  ;;  %v22_v5 = vld [vmem:[%s395_s0 + $0x50] sm:$0xff]  ;;  %v21_v6 = vld [vmem:[%s395_s0 + $0x48] sm:$0xff]  ;;  %239 = vset.pattern.permute.xlu0 %v279_v11  ;;  %240 = vset.pattern.permute.xlu1 %v280_v20  ;;  %v281_v21 = vmov 0   ;;  %vm125_vm1 = vcmask 130048   ;;  %s191_s23 = sshll.u32 %s397_s2, 4  ;;  %s192_s23 = int_to_ptr.hbm [resolvable:$true] %s191_s23 }
   0x5   :  { %v20_v7 = vld [vmem:[%s395_s0 + $0x40] sm:$0xff]  ;;  %v19_v8 = vld [vmem:[%s395_s0 + $0x38] sm:$0xff]  ;;  %v18_v9 = vld [vmem:[%s395_s0 + $0x30] sm:$0xff] }
   0x6   :  { %201 = vmatpush.xpose.msk.msra.mxu0 %vm42_vm0, %v26_v1  ;;  %220 = vmatpush.xpose.msk.msra.mxu2 %vm42_vm0, %v26_v1  ;;  %v29_v10 = vld [vmem:[%s396_s1 + $0x8] sm:$0xff]  ;;  %v16_v13 = vld [vmem:[%s395_s0 + $0x20] sm:$0xff]  ;;  %v15_v15 = vld [vmem:[%s395_s0 + $0x18] sm:$0xff] }
   0x7   :  { %39 = vperm.xlu0 %239, %v29_v10   ;;  %v17_v12 = vld [vmem:[%s395_s0 + $0x28] sm:$0xff]  ;;  %v28_v14 = vld [vmem:[%s396_s1] sm:$0xff]  ;;  %v14_v16 = vld [vmem:[%s395_s0 + $0x10] sm:$0xff] }
   0x8   :  { %v13_v17 = vld [vmem:[%s395_s0 + $0x8] sm:$0xff]  ;;  %v12_v18 = vld [vmem:[%s395_s0] sm:$0xff]  ;;  %v30_v19 = vld [vmem:[%s396_s1 + $0x10] sm:$0xff] }
   0x9   :  { %122 = vperm.xlu1 %240, %v30_v19   ;;  %v31_v23 = vld [vmem:[%s396_s1 + $0x18] sm:$0xff]  ;;  %s282_s1 = smov [#allocation2]  }
   0xa   :  { %202 = vmatpush.xpose.msk.msra.mxu0 %vm42_vm0, %v25_v2  ;;  %221 = vmatpush.xpose.msk.msra.mxu2 %vm42_vm0, %v25_v2  ;;  %s189_s20 = sshll.u32 %s282_s1, 4  ;;  %s190_s20 = int_to_ptr.vmem [resolvable:$true] %s189_s20 }
   0xe   :  { %203 = vmatpush.xpose.msk.msra.mxu0 %vm42_vm0, %v24_v3  ;;  %222 = vmatpush.xpose.msk.msra.mxu2 %vm42_vm0, %v24_v3 }
   0xf   :  { %34 = vperm.xlu0 %239, %v28_v14  }
  0x11   :  { %241 = vset.pattern.permute.xlu1 %v281_v21 }
  0x12   :  { %204 = vmatpush.xpose.msk.msra.mxu0 %vm42_vm0, %v23_v4  ;;  %223 = vmatpush.xpose.msk.msra.mxu2 %vm42_vm0, %v23_v4 }
  0x13   :  { %151 = vperm.xlu1 %241, %v31_v23  }
  0x16   :  { %205 = vmatpush.xpose.msk.msra.mxu0 %vm42_vm0, %v22_v5  ;;  %224 = vmatpush.xpose.msk.msra.mxu2 %vm42_vm0, %v22_v5 }
  0x17   :  { %242 = vset.pattern.permute.xlu0 %v281_v21 }
  0x1a   :  { %206 = vmatpush.xpose.msk.msra.mxu0 %vm42_vm0, %v21_v6  ;;  %225 = vmatpush.xpose.msk.msra.mxu2 %vm42_vm0, %v21_v6 }
  0x1e   :  { %207 = vmatpush.xpose.msk.msra.mxu0 %vm42_vm0, %v20_v7  ;;  %226 = vmatpush.xpose.msk.msra.mxu2 %vm42_vm0, %v20_v7 }
  0x22   :  { %208 = vmatpush.xpose.msk.msra.mxu0 %vm42_vm0, %v19_v8  ;;  %227 = vmatpush.xpose.msk.msra.mxu2 %vm42_vm0, %v19_v8 }
  0x26   :  { %209 = vmatpush.xpose.msk.msra.mxu0 %vm42_vm0, %v18_v9  ;;  %228 = vmatpush.xpose.msk.msra.mxu2 %vm42_vm0, %v18_v9 }
  0x2a   :  { %210 = vmatpush.xpose.msk.msra.mxu0 %vm42_vm0, %v17_v12  ;;  %229 = vmatpush.xpose.msk.msra.mxu2 %vm42_vm0, %v17_v12 }
  0x2e   :  { %211 = vmatpush.xpose.msk.msra.mxu0 %vm42_vm0, %v16_v13  ;;  %230 = vmatpush.xpose.msk.msra.mxu2 %vm42_vm0, %v16_v13 }
  0x32   :  { %212 = vmatpush.xpose.msk.msra.mxu0 %vm42_vm0, %v15_v15  ;;  %231 = vmatpush.xpose.msk.msra.mxu2 %vm42_vm0, %v15_v15 }
  0x36   :  { %213 = vmatpush.xpose.msk.msra.mxu0 %vm42_vm0, %v14_v16  ;;  %232 = vmatpush.xpose.msk.msra.mxu2 %vm42_vm0, %v14_v16 }
  0x3a   :  { %214 = vmatpush.xpose.msk.msra.mxu0 %vm42_vm0, %v13_v17  ;;  %233 = vmatpush.xpose.msk.msra.mxu2 %vm42_vm0, %v13_v17 }
  0x3e   :  { %215 = vmatpush.xpose.msk.msra.mxu0 %vm42_vm0, %v12_v18  ;;  %234 = vmatpush.xpose.msk.msra.mxu2 %vm42_vm0, %v12_v18 }
  0x41   :  { %216 = vmatmul.msk.f32.vlgmr.msra.gmra.mxu0 %vm42_vm0, %v28_v14  ;;  %217 = vmatmul.msk.f32.vlgmr.msra.gmra.mxu2 %vm42_vm0, %v29_v10 }
  0x79   :  { %v40_v22 = vpop.permute.xlu0 %39 }
  0x7b   :  { %v123_v31 = vpop.permute.xlu1 %122 }
  0x81   :  { %v35_v24 = vpop.permute.xlu0 %34 }
  0x85   :  { %v152_v34 = vpop.permute.xlu1 %151 }
  0xbe   :  { %v112_v25 = vpop.f32.mrf.mxu0 }
  0xbf   :  { %v113_v27 = vadd.f32 %v112_v25, %v35_v24 }
  0xc4   :  { %v115_v26 = vpop.f32.mrf.mxu2 }
  0xc5   :  { %v116_v28 = vadd.f32 %v115_v26, %v40_v22 }
  0xc7   :  { %243 = vtanh.f32 %v116_v28 }
  0xc8   :  { %245 = vtanh.f32 %v113_v27 }
  0xcd   :  { %v244_v29 = vpop.eup %243 }
  0xce   :  { %142 = vmatpush.msra.mxu1 %v244_v29  ;;  %v246_v30 = vpop.eup %245 }
  0xd0   :  { %143 = vmatpush.msra.mxu1 %v246_v30 }
  0xd1   :  { %218 = vmatmul.msk.f32.vlgmr.msra.gmra.mxu1 %vm125_vm1, %v30_v19 }
 0x14e   :  { %v145_v32 = vpop.f32.mrf.mxu1 }
 0x14f   :  { %v146_v33 = vadd.f32 %v145_v32, %v123_v31 }
 0x151   :  { %247 = vtanh.f32 %v146_v33 }
 0x157   :  { %v248_v35 = vpop.eup %247 }
 0x158   :  { %v154_v36 = vmul.f32 %v248_v35, %v152_v34 }
 0x15a   :  { %v155_v37 = vrot.slane %v154_v36, 4 }
 0x15c   :  { %v156_v38 = vadd.f32 %v155_v37, %v154_v36 }
 0x15e   :  { %v157_v39 = vrot.slane %v156_v38, 2 }
 0x160   :  { %v158_v40 = vadd.f32 %v157_v39, %v156_v38 }
 0x162   :  { %v159_v41 = vrot.slane %v158_v40, 1 }
 0x164   :  { %v160_v42 = vadd.f32 %v159_v41, %v158_v40 }
 0x166   :  { %161 = vmax.xlane.f32.xlu2 %v160_v42 }
 0x1d9   :  { %v162_v43 = vpop.xlane.xlu2 %161 }
 0x1da   :  { %v163_v44 = vsub.f32 %v160_v42, %v162_v43 }
 0x1dc   :  { %v164_v45 = vmul.f32 1.442695, %v163_v44 }
 0x1de   :  { %249 = vpow2.f32 %v164_v45 }
 0x1e4   :  { %v250_v46 = vpop.eup %249 }
 0x1e5   :  { %166 = vadd.xlane.f32.xlu2 %v250_v46 }
 0x258   :  { %v167_v47 = vpop.xlane.xlu2 %166 }
 0x259   :  { %251 = vrcp.f32 %v167_v47  ;;  %v179_v51 = vand.u32 2147483648, %v167_v47  ;;  %v177_v53 = vand.u32 2147483647, %v167_v47  ;;  %vm173_vm3 = vweird.f32 %v167_v47 }
 0x25b   :  { %v180_v55 = vor.u32 1.1754944e-38, %v179_v51  ;;  %vm178_vm5 = vcmp.eq.f32.partialorder %v177_v53, 8.507059e+37 }
 0x25f   :  { %v252_v48 = vpop.eup %251 }
 0x260   :  { %v169_v49 = vmul.f32 %v252_v48, %v167_v47  ;;  %vm174_vm2 = vweird.f32 %v252_v48 }
 0x261   :  { %vm175_vm4 = vmor %vm173_vm3, %vm174_vm2 }
 0x262   :  { %v170_v50 = vsub.f32 1.0, %v169_v49 }
 0x264   :  { %v171_v52 = vmul.f32 %v252_v48, %v170_v50 }
 0x266   :  { %v172_v54 = vadd.f32 %v252_v48, %v171_v52 }
 0x268   :  { %v176_v56 = vsel %vm175_vm4, %v252_v48, %v172_v54 }
 0x269   :  { %v181_v57 = vsel %vm178_vm5, %v180_v55, %v176_v56 }
 0x26a   :  { %v182_v58 = vmul.f32 %v250_v46, %v181_v57 }
 0x26c   :  { %183 = vst [vmem:[#allocation2] sm:$0x1] %v182_v58 }
 0x26d   :  { %194 = dma.vmem_to_hbm [thread:$0]  %s190_s20, 16, %s192_s23, [#allocation3]  }
 0x26e   :  { %277 = dma.done.wait [#allocation3], 16  }
 0x26f   :  { %278 = vsyncadd [#allocation3], 4294967280 }
 0x270   :  { %199 = vsyncpa [#allocation3], 1 }

</bundles_post_ra>
